<compile_context>
chip_gen: v7x
topology: tpu7x:2x2x1
jax: 0.10.0
libtpu: 0.0.40
codegen_flags: <defaults>
</compile_context>

<pallas_src>
import functools

import jax
import jax.numpy as jnp
from jax.experimental import pallas as pl
from jax.experimental.pallas import tpu as pltpu


def _cdiv(a, b):
    return -(-a // b)


def _round_up(a, b):
    return _cdiv(a, b) * b


def _round_down(a, b):
    return (a // b) * b


def _pow_const(x, gamma):
    """x**gamma with repeated multiplies for small integer gamma (keeps EUP free)."""
    g = float(gamma)
    if g == round(g) and 0.0 <= g <= 4.0:
        gi = int(round(g))
        if gi == 0:
            return jnp.ones_like(x)
        r = x
        for _ in range(gi - 1):
            r = r * x
        return r
    return jnp.power(x, g)


def _combined_loss_kernel(logits_ref, targets_ref,
                          inter_ref, psum_ref, tsum_ref, fsum_ref,
                          *, alpha, gamma, n_valid, tiles_per_chunk,
                          n_tiles, needs_mask, has_phantom):
    t = pl.program_id(2)
    gt = pl.program_id(1) * tiles_per_chunk + t      # global (unclamped) tile index

    # Zero the resident accumulators at the first tile of each (batch, chunk).
    @pl.when(t == 0)
    def _():
        inter_ref[...] = jnp.zeros_like(inter_ref)
        psum_ref[...] = jnp.zeros_like(psum_ref)
        tsum_ref[...] = jnp.zeros_like(tsum_ref)
        fsum_ref[...] = jnp.zeros_like(fsum_ref)

    def accumulate(masked):
        x = logits_ref[...].astype(jnp.float32)      # (1, C, TR, 128)
        tgt = targets_ref[...].astype(jnp.int32)     # (1, TR, 128)
        _, C, TR, _ = x.shape

        # Softmax over the class axis (slab axis -> pure VPU; matches
        # F.softmax(logits, dim=1)).
        m = jnp.max(x, axis=1, keepdims=True)
        e = jnp.exp(x - m)
        s = jnp.sum(e, axis=1, keepdims=True)
        r = pl.reciprocal(s, approx=True)            # EUP slot
        r = r * (2.0 - s * r)                        # one Newton step -> f32-level acc
        probs = e * r                                # (1, C, TR, 128)

        # One-hot condition; tiny (1,C,1,128) iota, no materialized f32 one-hot.
        cls = jax.lax.broadcasted_iota(jnp.int32, (1, C, 1, 128), 1)
        oh = tgt[:, None, :, :] == cls               # (1, C, TR, 128) bool

        if masked:
            # Only the boundary tile reaches here: mask padded / OOB voxels via
            # where-selects so garbage (possibly NaN) reads cannot leak.
            base_row = gt * TR
            rows = jax.lax.broadcasted_iota(jnp.int32, tgt.shape, 1)
            lanes = jax.lax.broadcasted_iota(jnp.int32, tgt.shape, 2)
            valid = (base_row + rows) * 128 + lanes < n_valid   # (1, TR, 128)
            oh = jnp.logical_and(oh, valid[:, None, :, :])
            probs_src = jnp.where(valid[:, None, :, :], probs, 0.0)
        else:
            probs_src = probs

        pw = jnp.where(oh, probs, 0.0)               # probs * one_hot, fused
        oh_f = jnp.where(oh, 1.0, 0.0)

        # --- Dice lane partials (per class; lane reduce happens in the glue) ---
        inter_ref[...] += jnp.sum(pw, axis=2)[:, None]         # (1,1,C,128)
        psum_ref[...] += jnp.sum(probs_src, axis=2)[:, None]   # (1,1,C,128)
        tsum_ref[...] += jnp.sum(oh_f, axis=2)[:, None]        # (1,1,C,128)

        # --- Focal lane partials ---
        # torch: pt = sum(one_hot * (softmax + 1e-10), dim=1) == sum(pw) + 1e-10
        pt = jnp.sum(pw, axis=1) + 1e-10                       # (1, TR, 128)
        focal_vox = (-alpha) * _pow_const(1.0 - pt, gamma) * jnp.log(pt + 1e-10)
        if masked:
            focal_vox = jnp.where(valid, focal_vox, 0.0)
        fsum_ref[...] += jnp.sum(focal_vox, axis=1)[:, None, None]   # (1,1,1,128)

    def dispatch():
        if needs_mask:
            # Only the last real tile contains padded / OOB voxels; interior
            # tiles run the cheaper unmasked path.  Phantom tiles
            # (gt >= n_tiles, only possible with the chunk split) fall through
            # both branches and contribute nothing.
            @pl.when(gt == n_tiles - 1)
            def _():
                accumulate(True)

            @pl.when(gt < n_tiles - 1)
            def _():
                accumulate(False)
        else:
            accumulate(False)

    if has_phantom and not needs_mask:
        @pl.when(gt < n_tiles)
        def _():
            dispatch()
    else:
        dispatch()


def _default_num_chunks():
    # Two TensorCores per chip only on v7x; on single-TC chips the extra chunk
    # only adds an accumulator boundary.
    try:
        kind = jax.devices()[0].device_kind.lower()
    except Exception:
        return 1
    return 2 if "v7" in kind else 1


def _vmem_limit_bytes():
    cap = None
    try:
        cap = getattr(pltpu.get_tpu_info(), "vmem_capacity_bytes", None)
    except Exception:
        cap = None
    if not cap:
        cap = 64 * 1024 * 1024
    # ~half of physical VMEM: 64 MiB on 128-MiB v5e/v6e, 32 MiB on 64-MiB v7x.
    return int(min(max(cap // 2, 32 * 1024 * 1024), 64 * 1024 * 1024))


def combined_loss(logits, targets, *,
                  dice_weight=1.0, focal_weight=1.0,
                  smooth=1.0, alpha=0.25, gamma=2.0,
                  class_weights=None, tile_rows=None, num_chunks=None):
    """logits: [B, C, D, H, W] (f32 or bf16); targets: [B, D, H, W] int."""
    B, C = int(logits.shape[0]), int(logits.shape[1])
    spatial = tuple(int(d) for d in logits.shape[2:])
    N = 1
    for d in spatial:
        N *= d
    assert tuple(targets.shape) == (B,) + spatial

    # dtype handling: keep bf16 logits and int8/uint8 targets (halves HBM traffic);
    # never add a wrapper astype on the big tensor unless the dtype is unsupported.
    if logits.dtype not in (jnp.float32, jnp.bfloat16):
        logits = logits.astype(jnp.float32)
    if targets.dtype in (jnp.int8, jnp.uint8) and C <= 127:
        pass
    elif targets.dtype != jnp.int32:
        targets = targets.astype(jnp.int32)

    logit_sz = jnp.dtype(logits.dtype).itemsize
    tgt_sz = jnp.dtype(targets.dtype).itemsize
    # sublane alignment for the tile: (8,128) f32 / (16,128) bf16 / (32,128) int8
    row_align = max(8 if logit_sz == 4 else 16, 32 if tgt_sz == 1 else 8)

    rows_valid = _cdiv(N, 128)
    # Zero-copy fast path: keep logits unpadded (the (rows,128) reshape is free)
    # whenever N is lane-aligned and there is at least one full row group.  The
    # boundary tile simply reads past the end of the row axis (standard Pallas
    # uneven tiling); those voxels are masked in-kernel.
    if N % 128 == 0 and rows_valid >= row_align:
        rows_total = rows_valid
        pad_elems = 0
    else:
        # TODO(synk): a tiny second pallas_call over the ragged tail would avoid
        # this full pad copy for 128-unaligned N; only small/odd inputs hit it.
        rows_total = max(_round_up(rows_valid, row_align), row_align)
        pad_elems = rows_total * 128 - N

    logits_r = logits.reshape(B, C, N)
    targets_r = targets.reshape(B, N)
    if pad_elems:
        logits_r = jnp.pad(logits_r, ((0, 0), (0, 0), (0, pad_elems)))
        targets_r = jnp.pad(targets_r, ((0, 0), (0, pad_elems)))
    logits_r = logits_r.reshape(B, C, rows_total, 128)
    targets_r = targets_r.reshape(B, rows_total, 128)

    # ---- tile sizing: budget covers double-buffered I/O *and* the ~7C live
    # full-tile f32 temporaries the body materializes. ----
    vmem_limit = _vmem_limit_bytes()
    if tile_rows is None:
        io_per_row = 2 * 128 * (C * logit_sz + tgt_sz)       # 2x-buffered inputs
        tmp_per_row = 128 * 4 * (7 * C + 8)                  # live f32 temporaries
        budget = vmem_limit - 2 * 1024 * 1024                # headroom (accums etc.)
        tile_rows = max(row_align, budget // (io_per_row + tmp_per_row))
    tile_rows = int(min(tile_rows, 4096, _round_down(rows_total, row_align)))
    tile_rows = max(row_align, _round_down(tile_rows, row_align))

    n_tiles = _cdiv(rows_total, tile_rows)
    if num_chunks is None:
        num_chunks = _default_num_chunks()
    n_chunks = int(num_chunks) if n_tiles >= 2 else 1
    n_chunks = max(1, min(n_chunks, n_tiles))
    tiles_per_chunk = _cdiv(n_tiles, n_chunks)
    has_phantom = n_chunks * tiles_per_chunk > n_tiles
    needs_mask = n_tiles * tile_rows * 128 != N

    if has_phantom:
        def tile_of(c, t):
            # Clamp phantom steps onto the last real tile (their compute is skipped).
            return jnp.minimum(c * tiles_per_chunk + t, n_tiles - 1)
    else:
        def tile_of(c, t):
            return c * tiles_per_chunk + t

    kernel = functools.partial(
        _combined_loss_kernel,
        alpha=float(alpha), gamma=float(gamma), n_valid=N,
        tiles_per_chunk=tiles_per_chunk, n_tiles=n_tiles,
        needs_mask=needs_mask, has_phantom=has_phantom)

    out_shapes = (
        jax.ShapeDtypeStruct((B, n_chunks, C, 128), jnp.float32),  # intersection
        jax.ShapeDtypeStruct((B, n_chunks, C, 128), jnp.float32),  # sum of probs
        jax.ShapeDtypeStruct((B, n_chunks, C, 128), jnp.float32),  # sum of one-hot
        jax.ShapeDtypeStruct((B, n_chunks, 1, 128), jnp.float32),  # focal sum
    )

    grid_spec = pl.GridSpec(
        grid=(B, n_chunks, tiles_per_chunk),
        in_specs=[
            pl.BlockSpec((1, C, tile_rows, 128),
                         lambda b, c, t: (b, 0, tile_of(c, t), 0)),
            pl.BlockSpec((1, tile_rows, 128),
                         lambda b, c, t: (b, tile_of(c, t), 0)),
        ],
        out_specs=(
            pl.BlockSpec((1, 1, C, 128), lambda b, c, t: (b, c, 0, 0)),
            pl.BlockSpec((1, 1, C, 128), lambda b, c, t: (b, c, 0, 0)),
            pl.BlockSpec((1, 1, C, 128), lambda b, c, t: (b, c, 0, 0)),
            pl.BlockSpec((1, 1, 1, 128), lambda b, c, t: (b, c, 0, 0)),
        ),
    )

    inter_p, psum_p, tsum_p, fsum_p = pl.pallas_call(
        kernel,
        out_shape=out_shapes,
        grid_spec=grid_spec,
        compiler_params=pltpu.CompilerParams(
            dimension_semantics=("parallel", "parallel", "arbitrary"),
            vmem_limit_bytes=vmem_limit),
    )(logits_r, targets_r)

    # ---- tiny scalar combine (glue): chunk + lane reductions, dice/focal ----
    inter = jnp.sum(inter_p, axis=(1, 3))      # [B, C]
    psum = jnp.sum(psum_p, axis=(1, 3))        # [B, C]
    tsum = jnp.sum(tsum_p, axis=(1, 3))        # [B, C]  (= per-class voxel counts)
    fsum = jnp.sum(fsum_p, axis=(1, 2, 3))     # [B]

    # DiceLoss
    dice_scores = (2.0 * inter + smooth) / (psum + tsum + smooth)
    if class_weights is not None:
        cw = jnp.asarray(class_weights, jnp.float32)
        dice_scores = dice_scores * cw
    dice_loss = jnp.maximum(1.0 - jnp.mean(dice_scores), 0.0)

    # FocalLoss
    focal_per_batch = fsum / float(N)          # mean over (D, H, W)
    if class_weights is not None:
        cw = jnp.asarray(class_weights, jnp.float32)
        # mean_v cw[target_v] = sum_c count_bc * cw_c / N -- computed from the
        # per-class counts the kernel already produced (no second pass over targets).
        batch_w = (tsum @ cw) / float(N)
        focal_per_batch = focal_per_batch * batch_w
    focal_loss = jnp.maximum(jnp.mean(focal_per_batch), 0.0)

    total = dice_weight * dice_loss + focal_weight * focal_loss
    return jnp.maximum(total, 0.0)


def _reference_loss(logits, targets, *, dice_weight=1.0, focal_weight=1.0,
                    smooth=1.0, alpha=0.25, gamma=2.0, class_weights=None):
    """Plain-JAX reference mirroring the PyTorch CombinedLoss."""
    B, C = logits.shape[0], logits.shape[1]
    logits = logits.astype(jnp.float32)
    targets = targets.astype(jnp.int32)
    probs = jax.nn.softmax(logits, axis=1)
    one_hot = jnp.moveaxis(jax.nn.one_hot(targets, C, dtype=jnp.float32), -1, 1)
    pf = probs.reshape(B, C, -1)
    tf = one_hot.reshape(B, C, -1)
    inter = jnp.sum(pf * tf, axis=2)
    union = jnp.sum(pf, axis=2) + jnp.sum(tf, axis=2)
    dice_scores = (2.0 * inter + smooth) / (union + smooth)
    if class_weights is not None:
        dice_scores = dice_scores * jnp.asarray(class_weights, jnp.float32)
    dice = jnp.maximum(1.0 - jnp.mean(dice_scores), 0.0)

    probs_eps = probs + 1e-10
    pt = jnp.sum(one_hot * probs_eps, axis=1)
    focal = -alpha * (1.0 - pt) ** gamma * jnp.log(pt + 1e-10)
    focal = jnp.mean(focal.reshape(B, -1), axis=1)
    if class_weights is not None:
        cw = jnp.asarray(class_weights, jnp.float32)
        focal = focal * jnp.mean(cw[targets.reshape(B, -1)], axis=1)
    focal = jnp.maximum(jnp.mean(focal), 0.0)
    return jnp.maximum(dice_weight * dice + focal_weight * focal, 0.0)


if __name__ == "__main__":
    key = jax.random.PRNGKey(0)
    k1, k2, k3, k4, k5, k6, k7, k8 = jax.random.split(key, 8)

    # --- 1: f32 logits, int32 targets, tiny volume (pad fallback + masking) ---
    B, C, D, H, W = 2, 4, 4, 8, 8
    logits = jax.random.normal(k1, (B, C, D, H, W), dtype=jnp.float32)
    targets = jax.random.randint(k2, (B, D, H, W), 0, C, dtype=jnp.int32)
    out = jax.block_until_ready(combined_loss(logits, targets))
    ref = _reference_loss(logits, targets)
    assert jnp.allclose(out, ref, atol=2e-5, rtol=2e-5), (out, ref)

    # --- 2: int8 targets + class weights + 128-unaligned voxel count ---
    B, C, D, H, W = 2, 3, 3, 8, 8
    logits = jax.random.normal(k3, (B, C, D, H, W), dtype=jnp.float32)
    targets = jax.random.randint(k4, (B, D, H, W), 0, C, dtype=jnp.int32).astype(jnp.int8)
    cw = jnp.array([0.5, 1.0, 2.0], dtype=jnp.float32)
    out = jax.block_until_ready(
        combined_loss(logits, targets, class_weights=cw,
                      dice_weight=0.7, focal_weight=1.3))
    ref = _reference_loss(logits, targets, class_weights=cw,
                          dice_weight=0.7, focal_weight=1.3)
    assert jnp.allclose(out, ref, atol=2e-5, rtol=2e-5), (out, ref)

    # --- 3: bf16 logits, lane-aligned (zero-copy, unmasked) path ---
    B, C, D, H, W = 1, 4, 8, 16, 16
    logits = jax.random.normal(k5, (B, C, D, H, W), dtype=jnp.float32).astype(jnp.bfloat16)
    targets = jax.random.randint(k6, (B, D, H, W), 0, C, dtype=jnp.int32)
    out = jax.block_until_ready(combined_loss(logits, targets))
    ref = _reference_loss(logits.astype(jnp.float32), targets)
    assert jnp.allclose(out, ref, atol=1e-4, rtol=1e-4), (out, ref)

    # --- 4: multi-tile + 2 chunks + phantom tile + boundary-tile OOB masking ---
    B, C, D, H, W = 2, 4, 5, 16, 32
    logits = jax.random.normal(k7, (B, C, D, H, W), dtype=jnp.float32)
    targets = jax.random.randint(k8, (B, D, H, W), 0, C, dtype=jnp.int32)
    out = jax.block_until_ready(
        combined_loss(logits, targets, tile_rows=8, num_chunks=2))
    ref = _reference_loss(logits, targets)
    assert jnp.allclose(out, ref, atol=2e-5, rtol=2e-5), (out, ref)

    print("KERNEL_OK")
</pallas_src>

<mosaic_0001>
module attributes {stable_mosaic.version = 11 : i64} {
  func.func @_combined_loss_kernel(%arg0: i32, %arg1: i32, %arg2: i32, %arg3: memref<1x4x8x128xf32, #tpu.memory_space<vmem>>, %arg4: memref<1x8x128xi32, #tpu.memory_space<vmem>>, %arg5: memref<1x1x4x128xf32, #tpu.memory_space<vmem>>, %arg6: memref<1x1x4x128xf32, #tpu.memory_space<vmem>>, %arg7: memref<1x1x4x128xf32, #tpu.memory_space<vmem>>, %arg8: memref<1x1x1x128xf32, #tpu.memory_space<vmem>>) attributes {dimension_semantics = [#tpu.dimension_semantics<parallel>, #tpu.dimension_semantics<parallel>, #tpu.dimension_semantics<arbitrary>], iteration_bounds = array<i64: 2, 1, 1>, scalar_prefetch = 0 : i64, scratch_operands = 0 : i64, tpu.core_type = #tpu.core_type<tc>, window_params = [{transform_indices = @transform_0, window_bounds = array<i64: 1, 4, 8, 128>}, {transform_indices = @transform_1, window_bounds = array<i64: 1, 8, 128>}, {transform_indices = @transform_2, window_bounds = array<i64: 1, 1, 4, 128>}, {transform_indices = @transform_3, window_bounds = array<i64: 1, 1, 4, 128>}, {transform_indices = @transform_4, window_bounds = array<i64: 1, 1, 4, 128>}, {transform_indices = @transform_5, window_bounds = array<i64: 1, 1, 1, 128>}]} {
    %c1_i32 = arith.constant 1 : i32
    %0 = arith.muli %arg1, %c1_i32 : i32
    %1 = arith.addi %0, %arg2 : i32
    %c0_i32 = arith.constant 0 : i32
    %2 = arith.cmpi eq, %arg2, %c0_i32 : i32
    %3 = arith.extui %2 : i1 to i32
    %c0_i32_0 = arith.constant 0 : i32
    %4 = arith.cmpi ne, %3, %c0_i32_0 : i32
    scf.if %4 {
      %cst = arith.constant 0.000000e+00 : f32
      %11 = vector.broadcast %cst : f32 to vector<1x1x4x128xf32>
      %c0 = arith.constant 0 : index
      %c0_5 = arith.constant 0 : index
      %c0_6 = arith.constant 0 : index
      %c0_7 = arith.constant 0 : index
      %12 = vector.load %arg5[%c0, %c0_5, %c0_6, %c0_7] : memref<1x1x4x128xf32, #tpu.memory_space<vmem>>, vector<1x1x4x128xf32>
      tpu.vector_store %arg5[%c0, %c0_5, %c0_6, %c0_7], %11 {strides = array<i32>} : memref<1x1x4x128xf32, #tpu.memory_space<vmem>>, vector<1x1x4x128xf32>,
      %cst_8 = arith.constant 0.000000e+00 : f32
      %13 = vector.broadcast %cst_8 : f32 to vector<1x1x4x128xf32>
      %c0_9 = arith.constant 0 : index
      %c0_10 = arith.constant 0 : index
      %c0_11 = arith.constant 0 : index
      %c0_12 = arith.constant 0 : index
      %14 = vector.load %arg6[%c0_9, %c0_10, %c0_11, %c0_12] : memref<1x1x4x128xf32, #tpu.memory_space<vmem>>, vector<1x1x4x128xf32>
      tpu.vector_store %arg6[%c0_9, %c0_10, %c0_11, %c0_12], %13 {strides = array<i32>} : memref<1x1x4x128xf32, #tpu.memory_space<vmem>>, vector<1x1x4x128xf32>,
      %cst_13 = arith.constant 0.000000e+00 : f32
      %15 = vector.broadcast %cst_13 : f32 to vector<1x1x4x128xf32>
      %c0_14 = arith.constant 0 : index
      %c0_15 = arith.constant 0 : index
      %c0_16 = arith.constant 0 : index
      %c0_17 = arith.constant 0 : index
      %16 = vector.load %arg7[%c0_14, %c0_15, %c0_16, %c0_17] : memref<1x1x4x128xf32, #tpu.memory_space<vmem>>, vector<1x1x4x128xf32>
      tpu.vector_store %arg7[%c0_14, %c0_15, %c0_16, %c0_17], %15 {strides = array<i32>} : memref<1x1x4x128xf32, #tpu.memory_space<vmem>>, vector<1x1x4x128xf32>,
      %cst_18 = arith.constant 0.000000e+00 : f32
      %17 = vector.broadcast %cst_18 : f32 to vector<1x1x1x128xf32>
      %c0_19 = arith.constant 0 : index
      %c0_20 = arith.constant 0 : index
      %c0_21 = arith.constant 0 : index
      %c0_22 = arith.constant 0 : index
      %18 = vector.load %arg8[%c0_19, %c0_20, %c0_21, %c0_22] : memref<1x1x1x128xf32, #tpu.memory_space<vmem>>, vector<1x1x1x128xf32>
      tpu.vector_store %arg8[%c0_19, %c0_20, %c0_21, %c0_22], %17 {strides = array<i32>} : memref<1x1x1x128xf32, #tpu.memory_space<vmem>>, vector<1x1x1x128xf32>,
    } else {
    }
    %c0_i32_1 = arith.constant 0 : i32
    %5 = arith.cmpi eq, %1, %c0_i32_1 : i32
    %6 = arith.extui %5 : i1 to i32
    %c0_i32_2 = arith.constant 0 : i32
    %7 = arith.cmpi ne, %6, %c0_i32_2 : i32
    scf.if %7 {
      %c0 = arith.constant 0 : index
      %c0_5 = arith.constant 0 : index
      %c0_6 = arith.constant 0 : index
      %c0_7 = arith.constant 0 : index
      %11 = vector.load %arg3[%c0, %c0_5, %c0_6, %c0_7] : memref<1x4x8x128xf32, #tpu.memory_space<vmem>>, vector<1x4x8x128xf32>
      %c0_8 = arith.constant 0 : index
      %c0_9 = arith.constant 0 : index
      %c0_10 = arith.constant 0 : index
      %12 = vector.load %arg4[%c0_8, %c0_9, %c0_10] : memref<1x8x128xi32, #tpu.memory_space<vmem>>, vector<1x8x128xi32>
      %cst = arith.constant dense<0xFF800000> : vector<1x8x128xf32>
      %13 = vector.multi_reduction <maximumf>, %11, %cst [1] : vector<1x4x8x128xf32> to vector<1x8x128xf32>
      %14 = vector.shape_cast %13 : vector<1x8x128xf32> to vector<1x1x8x128xf32>
      %15 = vector.broadcast %14 : vector<1x1x8x128xf32> to vector<1x4x8x128xf32>
      %16 = arith.subf %11, %15 : vector<1x4x8x128xf32>
      %17 = math.exp %16 : vector<1x4x8x128xf32>
      %cst_11 = arith.constant dense<0.000000e+00> : vector<1x8x128xf32>
      %18 = vector.multi_reduction <add>, %17, %cst_11 [1] : vector<1x4x8x128xf32> to vector<1x8x128xf32>
      %19 = vector.shape_cast %18 : vector<1x8x128xf32> to vector<1x1x8x128xf32>
      %20 = tpu.reciprocal %19 {approx = true} : vector<1x1x8x128xf32> -> vector<1x1x8x128xf32>
      %21 = arith.mulf %19, %20 : vector<1x1x8x128xf32>
      %cst_12 = arith.constant 2.000000e+00 : f32
      %22 = vector.broadcast %cst_12 : f32 to vector<1x1x8x128xf32>
      %23 = arith.subf %22, %21 : vector<1x1x8x128xf32>
      %24 = arith.mulf %20, %23 : vector<1x1x8x128xf32>
      %25 = vector.broadcast %24 : vector<1x1x8x128xf32> to vector<1x4x8x128xf32>
      %26 = arith.mulf %17, %25 : vector<1x4x8x128xf32>
      %27 = tpu.iota {dimensions = array<i32: 1>} : vector<1x4x1x128xi32>
      %28 = vector.shape_cast %12 : vector<1x8x128xi32> to vector<1x1x8x128xi32>
      %29 = vector.broadcast %28 : vector<1x1x8x128xi32> to vector<1x4x8x128xi32>
      %30 = vector.broadcast %27 : vector<1x4x1x128xi32> to vector<1x4x8x128xi32>
      %31 = arith.cmpi eq, %29, %30 : vector<1x4x8x128xi32>
      %c8_i32 = arith.constant 8 : i32
      %32 = arith.muli %1, %c8_i32 : i32
      %33 = tpu.iota {dimensions = array<i32: 1>} : vector<1x8x128xi32>
      %34 = tpu.iota {dimensions = array<i32: 2>} : vector<1x8x128xi32>
      %35 = vector.broadcast %32 : i32 to vector<1x8x128xi32>
      %36 = arith.addi %35, %33 : vector<1x8x128xi32>
      %c128_i32 = arith.constant 128 : i32
      %37 = vector.broadcast %c128_i32 : i32 to vector<1x8x128xi32>
      %38 = arith.muli %36, %37 : vector<1x8x128xi32>
      %39 = arith.addi %38, %34 : vector<1x8x128xi32>
      %c256_i32 = arith.constant 256 : i32
      %40 = vector.broadcast %c256_i32 : i32 to vector<1x8x128xi32>
      %41 = arith.cmpi slt, %39, %40 : vector<1x8x128xi32>
      %42 = vector.shape_cast %41 : vector<1x8x128xi1> to vector<1x1x8x128xi1>
      %43 = vector.broadcast %42 : vector<1x1x8x128xi1> to vector<1x4x8x128xi1>
      %44 = arith.andi %31, %43 : vector<1x4x8x128xi1>
      %45 = vector.shape_cast %41 : vector<1x8x128xi1> to vector<1x1x8x128xi1>
      %cst_13 = arith.constant 0.000000e+00 : f32
      %46 = vector.shape_cast %45 : vector<1x1x8x128xi1> to vector<1x1x8x128xi1>
      %47 = vector.broadcast %46 : vector<1x1x8x128xi1> to vector<1x4x8x128xi1>
      %48 = vector.broadcast %cst_13 : f32 to vector<1x4x8x128xf32>
      %49 = arith.select %47, %26, %48 : vector<1x4x8x128xi1>, vector<1x4x8x128xf32>
      %cst_14 = arith.constant 0.000000e+00 : f32
      %50 = vector.broadcast %cst_14 : f32 to vector<1x4x8x128xf32>
      %51 = arith.select %44, %26, %50 : vector<1x4x8x128xi1>, vector<1x4x8x128xf32>
      %cst_15 = arith.constant 1.000000e+00 : f32
      %cst_16 = arith.constant 0.000000e+00 : f32
      %52 = vector.broadcast %cst_15 : f32 to vector<1x4x8x128xf32>
      %53 = vector.broadcast %cst_16 : f32 to vector<1x4x8x128xf32>
      %54 = arith.select %44, %52, %53 : vector<1x4x8x128xi1>, vector<1x4x8x128xf32>
      %c0_17 = arith.constant 0 : index
      %c0_18 = arith.constant 0 : index
      %c0_19 = arith.constant 0 : index
      %c0_20 = arith.constant 0 : index
      %55 = vector.load %arg5[%c0_17, %c0_18, %c0_19, %c0_20] : memref<1x1x4x128xf32, #tpu.memory_space<vmem>>, vector<1x1x4x128xf32>
      %cst_21 = arith.constant dense<0.000000e+00> : vector<1x4x128xf32>
      %56 = vector.multi_reduction <add>, %51, %cst_21 [2] : vector<1x4x8x128xf32> to vector<1x4x128xf32>
      %57 = vector.shape_cast %56 : vector<1x4x128xf32> to vector<1x1x4x128xf32>
      %58 = arith.addf %55, %57 : vector<1x1x4x128xf32>
      %c0_22 = arith.constant 0 : index
      %c0_23 = arith.constant 0 : index
      %c0_24 = arith.constant 0 : index
      %c0_25 = arith.constant 0 : index
      %59 = vector.load %arg5[%c0_22, %c0_23, %c0_24, %c0_25] : memref<1x1x4x128xf32, #tpu.memory_space<vmem>>, vector<1x1x4x128xf32>
      tpu.vector_store %arg5[%c0_22, %c0_23, %c0_24, %c0_25], %58 {strides = array<i32>} : memref<1x1x4x128xf32, #tpu.memory_space<vmem>>, vector<1x1x4x128xf32>,
      %c0_26 = arith.constant 0 : index
      %c0_27 = arith.constant 0 : index
      %c0_28 = arith.constant 0 : index
      %c0_29 = arith.constant 0 : index
      %60 = vector.load %arg6[%c0_26, %c0_27, %c0_28, %c0_29] : memref<1x1x4x128xf32, #tpu.memory_space<vmem>>, vector<1x1x4x128xf32>
      %cst_30 = arith.constant dense<0.000000e+00> : vector<1x4x128xf32>
      %61 = vector.multi_reduction <add>, %49, %cst_30 [2] : vector<1x4x8x128xf32> to vector<1x4x128xf32>
      %62 = vector.shape_cast %61 : vector<1x4x128xf32> to vector<1x1x4x128xf32>
      %63 = arith.addf %60, %62 : vector<1x1x4x128xf32>
      %c0_31 = arith.constant 0 : index
      %c0_32 = arith.constant 0 : index
      %c0_33 = arith.constant 0 : index
      %c0_34 = arith.constant 0 : index
      %64 = vector.load %arg6[%c0_31, %c0_32, %c0_33, %c0_34] : memref<1x1x4x128xf32, #tpu.memory_space<vmem>>, vector<1x1x4x128xf32>
      tpu.vector_store %arg6[%c0_31, %c0_32, %c0_33, %c0_34], %63 {strides = array<i32>} : memref<1x1x4x128xf32, #tpu.memory_space<vmem>>, vector<1x1x4x128xf32>,
      %c0_35 = arith.constant 0 : index
      %c0_36 = arith.constant 0 : index
      %c0_37 = arith.constant 0 : index
      %c0_38 = arith.constant 0 : index
      %65 = vector.load %arg7[%c0_35, %c0_36, %c0_37, %c0_38] : memref<1x1x4x128xf32, #tpu.memory_space<vmem>>, vector<1x1x4x128xf32>
      %cst_39 = arith.constant dense<0.000000e+00> : vector<1x4x128xf32>
      %66 = vector.multi_reduction <add>, %54, %cst_39 [2] : vector<1x4x8x128xf32> to vector<1x4x128xf32>
      %67 = vector.shape_cast %66 : vector<1x4x128xf32> to vector<1x1x4x128xf32>
      %68 = arith.addf %65, %67 : vector<1x1x4x128xf32>
      %c0_40 = arith.constant 0 : index
      %c0_41 = arith.constant 0 : index
      %c0_42 = arith.constant 0 : index
      %c0_43 = arith.constant 0 : index
      %69 = vector.load %arg7[%c0_40, %c0_41, %c0_42, %c0_43] : memref<1x1x4x128xf32, #tpu.memory_space<vmem>>, vector<1x1x4x128xf32>
      tpu.vector_store %arg7[%c0_40, %c0_41, %c0_42, %c0_43], %68 {strides = array<i32>} : memref<1x1x4x128xf32, #tpu.memory_space<vmem>>, vector<1x1x4x128xf32>,
      %cst_44 = arith.constant dense<0.000000e+00> : vector<1x8x128xf32>
      %70 = vector.multi_reduction <add>, %51, %cst_44 [1] : vector<1x4x8x128xf32> to vector<1x8x128xf32>
      %cst_45 = arith.constant 1.000000e-10 : f32
      %71 = vector.broadcast %cst_45 : f32 to vector<1x8x128xf32>
      %72 = arith.addf %70, %71 : vector<1x8x128xf32>
      %cst_46 = arith.constant 1.000000e+00 : f32
      %73 = vector.broadcast %cst_46 : f32 to vector<1x8x128xf32>
      %74 = arith.subf %73, %72 : vector<1x8x128xf32>
      %75 = arith.mulf %74, %74 : vector<1x8x128xf32>
      %cst_47 = arith.constant -2.500000e-01 : f32
      %76 = vector.broadcast %cst_47 : f32 to vector<1x8x128xf32>
      %77 = arith.mulf %76, %75 : vector<1x8x128xf32>
      %cst_48 = arith.constant 1.000000e-10 : f32
      %78 = vector.broadcast %cst_48 : f32 to vector<1x8x128xf32>
      %79 = arith.addf %72, %78 : vector<1x8x128xf32>
      %80 = math.log %79 : vector<1x8x128xf32>
      %81 = arith.mulf %77, %80 : vector<1x8x128xf32>
      %cst_49 = arith.constant 0.000000e+00 : f32
      %82 = vector.broadcast %cst_49 : f32 to vector<1x8x128xf32>
      %83 = arith.select %41, %81, %82 : vector<1x8x128xi1>, vector<1x8x128xf32>
      %c0_50 = arith.constant 0 : index
      %c0_51 = arith.constant 0 : index
      %c0_52 = arith.constant 0 : index
      %c0_53 = arith.constant 0 : index
      %84 = vector.load %arg8[%c0_50, %c0_51, %c0_52, %c0_53] : memref<1x1x1x128xf32, #tpu.memory_space<vmem>>, vector<1x1x1x128xf32>
      %cst_54 = arith.constant dense<0.000000e+00> : vector<1x128xf32>
      %85 = vector.multi_reduction <add>, %83, %cst_54 [1] : vector<1x8x128xf32> to vector<1x128xf32>
      %86 = vector.shape_cast %85 : vector<1x128xf32> to vector<1x1x1x128xf32>
      %87 = arith.addf %84, %86 : vector<1x1x1x128xf32>
      %c0_55 = arith.constant 0 : index
      %c0_56 = arith.constant 0 : index
      %c0_57 = arith.constant 0 : index
      %c0_58 = arith.constant 0 : index
      %88 = vector.load %arg8[%c0_55, %c0_56, %c0_57, %c0_58] : memref<1x1x1x128xf32, #tpu.memory_space<vmem>>, vector<1x1x1x128xf32>
      tpu.vector_store %arg8[%c0_55, %c0_56, %c0_57, %c0_58], %87 {strides = array<i32>} : memref<1x1x1x128xf32, #tpu.memory_space<vmem>>, vector<1x1x1x128xf32>,
    } else {
    }
    %c0_i32_3 = arith.constant 0 : i32
    %8 = arith.cmpi slt, %1, %c0_i32_3 : i32
    %9 = arith.extui %8 : i1 to i32
    %c0_i32_4 = arith.constant 0 : i32
    %10 = arith.cmpi ne, %9, %c0_i32_4 : i32
    scf.if %10 {
      %c0 = arith.constant 0 : index
      %c0_5 = arith.constant 0 : index
      %c0_6 = arith.constant 0 : index
      %c0_7 = arith.constant 0 : index
      %11 = vector.load %arg3[%c0, %c0_5, %c0_6, %c0_7] : memref<1x4x8x128xf32, #tpu.memory_space<vmem>>, vector<1x4x8x128xf32>
      %c0_8 = arith.constant 0 : index
      %c0_9 = arith.constant 0 : index
      %c0_10 = arith.constant 0 : index
      %12 = vector.load %arg4[%c0_8, %c0_9, %c0_10] : memref<1x8x128xi32, #tpu.memory_space<vmem>>, vector<1x8x128xi32>
      %cst = arith.constant dense<0xFF800000> : vector<1x8x128xf32>
      %13 = vector.multi_reduction <maximumf>, %11, %cst [1] : vector<1x4x8x128xf32> to vector<1x8x128xf32>
      %14 = vector.shape_cast %13 : vector<1x8x128xf32> to vector<1x1x8x128xf32>
      %15 = vector.broadcast %14 : vector<1x1x8x128xf32> to vector<1x4x8x128xf32>
      %16 = arith.subf %11, %15 : vector<1x4x8x128xf32>
      %17 = math.exp %16 : vector<1x4x8x128xf32>
      %cst_11 = arith.constant dense<0.000000e+00> : vector<1x8x128xf32>
      %18 = vector.multi_reduction <add>, %17, %cst_11 [1] : vector<1x4x8x128xf32> to vector<1x8x128xf32>
      %19 = vector.shape_cast %18 : vector<1x8x128xf32> to vector<1x1x8x128xf32>
      %20 = tpu.reciprocal %19 {approx = true} : vector<1x1x8x128xf32> -> vector<1x1x8x128xf32>
      %21 = arith.mulf %19, %20 : vector<1x1x8x128xf32>
      %cst_12 = arith.constant 2.000000e+00 : f32
      %22 = vector.broadcast %cst_12 : f32 to vector<1x1x8x128xf32>
      %23 = arith.subf %22, %21 : vector<1x1x8x128xf32>
      %24 = arith.mulf %20, %23 : vector<1x1x8x128xf32>
      %25 = vector.broadcast %24 : vector<1x1x8x128xf32> to vector<1x4x8x128xf32>
      %26 = arith.mulf %17, %25 : vector<1x4x8x128xf32>
      %27 = tpu.iota {dimensions = array<i32: 1>} : vector<1x4x1x128xi32>
      %28 = vector.shape_cast %12 : vector<1x8x128xi32> to vector<1x1x8x128xi32>
      %29 = vector.broadcast %28 : vector<1x1x8x128xi32> to vector<1x4x8x128xi32>
      %30 = vector.broadcast %27 : vector<1x4x1x128xi32> to vector<1x4x8x128xi32>
      %31 = arith.cmpi eq, %29, %30 : vector<1x4x8x128xi32>
      %cst_13 = arith.constant 0.000000e+00 : f32
      %32 = vector.broadcast %cst_13 : f32 to vector<1x4x8x128xf32>
      %33 = arith.select %31, %26, %32 : vector<1x4x8x128xi1>, vector<1x4x8x128xf32>
      %cst_14 = arith.constant 1.000000e+00 : f32
      %cst_15 = arith.constant 0.000000e+00 : f32
      %34 = vector.broadcast %cst_14 : f32 to vector<1x4x8x128xf32>
      %35 = vector.broadcast %cst_15 : f32 to vector<1x4x8x128xf32>
      %36 = arith.select %31, %34, %35 : vector<1x4x8x128xi1>, vector<1x4x8x128xf32>
      %c0_16 = arith.constant 0 : index
      %c0_17 = arith.constant 0 : index
      %c0_18 = arith.constant 0 : index
      %c0_19 = arith.constant 0 : index
      %37 = vector.load %arg5[%c0_16, %c0_17, %c0_18, %c0_19] : memref<1x1x4x128xf32, #tpu.memory_space<vmem>>, vector<1x1x4x128xf32>
      %cst_20 = arith.constant dense<0.000000e+00> : vector<1x4x128xf32>
      %38 = vector.multi_reduction <add>, %33, %cst_20 [2] : vector<1x4x8x128xf32> to vector<1x4x128xf32>
      %39 = vector.shape_cast %38 : vector<1x4x128xf32> to vector<1x1x4x128xf32>
      %40 = arith.addf %37, %39 : vector<1x1x4x128xf32>
      %c0_21 = arith.constant 0 : index
      %c0_22 = arith.constant 0 : index
      %c0_23 = arith.constant 0 : index
      %c0_24 = arith.constant 0 : index
      %41 = vector.load %arg5[%c0_21, %c0_22, %c0_23, %c0_24] : memref<1x1x4x128xf32, #tpu.memory_space<vmem>>, vector<1x1x4x128xf32>
      tpu.vector_store %arg5[%c0_21, %c0_22, %c0_23, %c0_24], %40 {strides = array<i32>} : memref<1x1x4x128xf32, #tpu.memory_space<vmem>>, vector<1x1x4x128xf32>,
      %c0_25 = arith.constant 0 : index
      %c0_26 = arith.constant 0 : index
      %c0_27 = arith.constant 0 : index
      %c0_28 = arith.constant 0 : index
      %42 = vector.load %arg6[%c0_25, %c0_26, %c0_27, %c0_28] : memref<1x1x4x128xf32, #tpu.memory_space<vmem>>, vector<1x1x4x128xf32>
      %cst_29 = arith.constant dense<0.000000e+00> : vector<1x4x128xf32>
      %43 = vector.multi_reduction <add>, %26, %cst_29 [2] : vector<1x4x8x128xf32> to vector<1x4x128xf32>
      %44 = vector.shape_cast %43 : vector<1x4x128xf32> to vector<1x1x4x128xf32>
      %45 = arith.addf %42, %44 : vector<1x1x4x128xf32>
      %c0_30 = arith.constant 0 : index
      %c0_31 = arith.constant 0 : index
      %c0_32 = arith.constant 0 : index
      %c0_33 = arith.constant 0 : index
      %46 = vector.load %arg6[%c0_30, %c0_31, %c0_32, %c0_33] : memref<1x1x4x128xf32, #tpu.memory_space<vmem>>, vector<1x1x4x128xf32>
      tpu.vector_store %arg6[%c0_30, %c0_31, %c0_32, %c0_33], %45 {strides = array<i32>} : memref<1x1x4x128xf32, #tpu.memory_space<vmem>>, vector<1x1x4x128xf32>,
      %c0_34 = arith.constant 0 : index
      %c0_35 = arith.constant 0 : index
      %c0_36 = arith.constant 0 : index
      %c0_37 = arith.constant 0 : index
      %47 = vector.load %arg7[%c0_34, %c0_35, %c0_36, %c0_37] : memref<1x1x4x128xf32, #tpu.memory_space<vmem>>, vector<1x1x4x128xf32>
      %cst_38 = arith.constant dense<0.000000e+00> : vector<1x4x128xf32>
      %48 = vector.multi_reduction <add>, %36, %cst_38 [2] : vector<1x4x8x128xf32> to vector<1x4x128xf32>
      %49 = vector.shape_cast %48 : vector<1x4x128xf32> to vector<1x1x4x128xf32>
      %50 = arith.addf %47, %49 : vector<1x1x4x128xf32>
      %c0_39 = arith.constant 0 : index
      %c0_40 = arith.constant 0 : index
      %c0_41 = arith.constant 0 : index
      %c0_42 = arith.constant 0 : index
      %51 = vector.load %arg7[%c0_39, %c0_40, %c0_41, %c0_42] : memref<1x1x4x128xf32, #tpu.memory_space<vmem>>, vector<1x1x4x128xf32>
      tpu.vector_store %arg7[%c0_39, %c0_40, %c0_41, %c0_42], %50 {strides = array<i32>} : memref<1x1x4x128xf32, #tpu.memory_space<vmem>>, vector<1x1x4x128xf32>,
      %cst_43 = arith.constant dense<0.000000e+00> : vector<1x8x128xf32>
      %52 = vector.multi_reduction <add>, %33, %cst_43 [1] : vector<1x4x8x128xf32> to vector<1x8x128xf32>
      %cst_44 = arith.constant 1.000000e-10 : f32
      %53 = vector.broadcast %cst_44 : f32 to vector<1x8x128xf32>
      %54 = arith.addf %52, %53 : vector<1x8x128xf32>
      %cst_45 = arith.constant 1.000000e+00 : f32
      %55 = vector.broadcast %cst_45 : f32 to vector<1x8x128xf32>
      %56 = arith.subf %55, %54 : vector<1x8x128xf32>
      %57 = arith.mulf %56, %56 : vector<1x8x128xf32>
      %cst_46 = arith.constant -2.500000e-01 : f32
      %58 = vector.broadcast %cst_46 : f32 to vector<1x8x128xf32>
      %59 = arith.mulf %58, %57 : vector<1x8x128xf32>
      %cst_47 = arith.constant 1.000000e-10 : f32
      %60 = vector.broadcast %cst_47 : f32 to vector<1x8x128xf32>
      %61 = arith.addf %54, %60 : vector<1x8x128xf32>
      %62 = math.log %61 : vector<1x8x128xf32>
      %63 = arith.mulf %59, %62 : vector<1x8x128xf32>
      %c0_48 = arith.constant 0 : index
      %c0_49 = arith.constant 0 : index
      %c0_50 = arith.constant 0 : index
      %c0_51 = arith.constant 0 : index
      %64 = vector.load %arg8[%c0_48, %c0_49, %c0_50, %c0_51] : memref<1x1x1x128xf32, #tpu.memory_space<vmem>>, vector<1x1x1x128xf32>
      %cst_52 = arith.constant dense<0.000000e+00> : vector<1x128xf32>
      %65 = vector.multi_reduction <add>, %63, %cst_52 [1] : vector<1x8x128xf32> to vector<1x128xf32>
      %66 = vector.shape_cast %65 : vector<1x128xf32> to vector<1x1x1x128xf32>
      %67 = arith.addf %64, %66 : vector<1x1x1x128xf32>
      %c0_53 = arith.constant 0 : index
      %c0_54 = arith.constant 0 : index
      %c0_55 = arith.constant 0 : index
      %c0_56 = arith.constant 0 : index
      %68 = vector.load %arg8[%c0_53, %c0_54, %c0_55, %c0_56] : memref<1x1x1x128xf32, #tpu.memory_space<vmem>>, vector<1x1x1x128xf32>
      tpu.vector_store %arg8[%c0_53, %c0_54, %c0_55, %c0_56], %67 {strides = array<i32>} : memref<1x1x1x128xf32, #tpu.memory_space<vmem>>, vector<1x1x1x128xf32>,
    } else {
    }
    return
  }
  func.func @transform_0(%arg0: i32, %arg1: i32, %arg2: i32) -> (i32, i32, i32, i32) {
    %c1_i32 = arith.constant 1 : i32
    %0 = arith.muli %arg1, %c1_i32 : i32
    %1 = arith.addi %0, %arg2 : i32
    %c0_i32 = arith.constant 0 : i32
    %c0_i32_0 = arith.constant 0 : i32
    %c0_i32_1 = arith.constant 0 : i32
    return %arg0, %c0_i32, %1, %c0_i32_0 : i32, i32, i32, i32
  }
  func.func @transform_1(%arg0: i32, %arg1: i32, %arg2: i32) -> (i32, i32, i32) {
    %c1_i32 = arith.constant 1 : i32
    %0 = arith.muli %arg1, %c1_i32 : i32
    %1 = arith.addi %0, %arg2 : i32
    %c0_i32 = arith.constant 0 : i32
    %c0_i32_0 = arith.constant 0 : i32
    return %arg0, %1, %c0_i32 : i32, i32, i32
  }
  func.func @transform_2(%arg0: i32, %arg1: i32, %arg2: i32) -> (i32, i32, i32, i32) {
    %c0_i32 = arith.constant 0 : i32
    %c0_i32_0 = arith.constant 0 : i32
    %c0_i32_1 = arith.constant 0 : i32
    return %arg0, %arg1, %c0_i32, %c0_i32_0 : i32, i32, i32, i32
  }
  func.func @transform_3(%arg0: i32, %arg1: i32, %arg2: i32) -> (i32, i32, i32, i32) {
    %c0_i32 = arith.constant 0 : i32
    %c0_i32_0 = arith.constant 0 : i32
    %c0_i32_1 = arith.constant 0 : i32
    return %arg0, %arg1, %c0_i32, %c0_i32_0 : i32, i32, i32, i32
  }
  func.func @transform_4(%arg0: i32, %arg1: i32, %arg2: i32) -> (i32, i32, i32, i32) {
    %c0_i32 = arith.constant 0 : i32
    %c0_i32_0 = arith.constant 0 : i32
    %c0_i32_1 = arith.constant 0 : i32
    return %arg0, %arg1, %c0_i32, %c0_i32_0 : i32, i32, i32, i32
  }
  func.func @transform_5(%arg0: i32, %arg1: i32, %arg2: i32) -> (i32, i32, i32, i32) {
    %c0_i32 = arith.constant 0 : i32
    %c0_i32_0 = arith.constant 0 : i32
    %c0_i32_1 = arith.constant 0 : i32
    return %arg0, %arg1, %c0_i32, %c0_i32_0 : i32, i32, i32, i32
  }
}

</mosaic_0001>

<bundles_post_ra>
// kernel: tpu_custom_call.1
= control target key start
LH: loop header
LB: loop body
LE: loop exit
PB: predicated region body
PF: predicated region fallthrough
CT: control target
= control target key end

     0   :  { %s1815_s0 = inlined_call_operand.hbm [shape: f32[2,4,8,128], index: 0, kind: input, shape index: {}]   ;;  %s1816_s1 = inlined_call_operand.hbm [shape: s32[2,8,128], index: 1, kind: input, shape index: {}]   ;;  %s1817_s2 = inlined_call_operand.hbm [shape: f32[2,1,4,128], index: 2, kind: output, shape index: {0}]   ;;  %s1818_s3 = inlined_call_operand.hbm [shape: f32[2,1,4,128], index: 3, kind: output, shape index: {1}]   ;;  %s1819_s4 = inlined_call_operand.hbm [shape: f32[2,1,4,128], index: 4, kind: output, shape index: {2}]   ;;  %s1820_s5 = inlined_call_operand.hbm [shape: f32[2,1,1,128], index: 5, kind: output, shape index: {3}]  }
   0x1   :  { %1826 = sst [smem:[#allocation20_spill]] %s1815_s0 }
   0x2   :  { %1827 = sst [smem:[#allocation21_spill]] %s1816_s1 }
   0x3   :  { %11 = vsyncpa [#allocation3], 0 }
   0x4   :  { %13 = vsyncpa [#allocation3 + $0x1], 0 }
   0x5   :  { %14 = vsyncpa [#allocation6], 0 }
   0x6   :  { %16 = vsyncpa [#allocation6 + $0x1], 0 }
   0x7   :  { %17 = vsyncpa [#allocation4], 0 }
   0x8   :  { %19 = vsyncpa [#allocation4 + $0x1], 0 }
   0x9   :  { %20 = vsyncpa [#allocation9], 0 }
   0xa   :  { %22 = vsyncpa [#allocation9 + $0x1], 0 }
   0xb   :  { %23 = vsyncpa [#allocation12], 0 }
   0xc   :  { %25 = vsyncpa [#allocation12 + $0x1], 0  ;;  %s1402_s18 = smov 0   ;;  %s1404_s19 = smov 0  }
   0xd   :  { %s1406_s20 = smov 0   ;;  %s1408_s21 = smov 0  }
   0xe   :  { %s1410_s22 = smov 0   ;;  %s1412_s23 = smov 0  }
   0xf LB: > { %1828 = sst [smem:[#allocation18_spill]] %s1357_s22  ;;  %s1433_s24 = sadd.s32 4294967295, %s1361_s23   ;;  %s1361_s23 = sphi %s1412_s23, %s31_s23   ;;  %s1357_s22 = sphi %s1410_s22, %s1854_s22   ;;  %s1353_s21 = sphi %s1408_s21, %s1853_s21   ;;  %s1349_s20 = sphi %s1406_s20, %s1857_s20   ;;  %s1345_s19 = sphi %s1404_s19, %s1856_s19   ;;  %s1341_s18 = sphi %s1402_s18, %s1855_s18  }
  0x10   : > { %s1822_s25 = sadd.s32 4294967294, %s1361_s23   ;;  %s50_s26 = sadd.s32 1, %s1357_s22 }
  0x11   : > { %s61_s27 = sadd.s32 1, %s1349_s20  ;;  %p52_p0 = scmp.ge.s32.totalorder %s50_s26, 2 }
  0x12   : > { %p68_p1 = scmp.ne.s32.totalorder %s1349_s20, %s1345_s19  ;;  %p69_p2 = scmp.eq.s32.totalorder %s1361_s23, 0 }
  0x13   : > { %p74_p3 = scmp.ne.s32.totalorder %s1345_s19, %s1341_s18  ;;  %s1859_s26 = smov (%p52_p0, %s50_s26), 0 }
  0x14   : > { %1829 = sst [smem:[#allocation19_spill]] %s1859_s26  ;;  %p1445_p4 = por %p69_p2, %p68_p1 }
  0x15   : > { %p75_p5 = scmp.eq.s32.totalorder %s1433_s24, 0  ;;  %s56_s29 = ssub.s32 %s1357_s22, %s1859_s26 }
  0x16   : > { %p130_p6 = scmp.eq.s32.totalorder %s1433_s24, 1  ;;  %p59_p7 = scmp.eq.s32.totalorder %s56_s29, 0 }
  0x17   : > { %p1453_p8 = por %p75_p5, %p74_p3  ;;  %p136_p10 = scmp.eq.s32.totalorder %s1822_s25, 1 }
  0x18   : > { %p1457_p9 = por %p130_p6, %p68_p1  ;;  %p1058_p13 = scmp.lt.s32.totalorder %s1361_s23, 2 }
  0x19   : > { %s1831_s30 = scalar_select %p1453_p8, 1, 0 }
  0x1a   : > { %s1832_s6 = scalar_select %p1457_p9, 1, 0 }
  0x1b   : > { %s1464_s7 = scalar_select %p59_p7, %s1349_s20, %s61_s27  }
  0x1c   : > { %p1466_p11 = por %p136_p10, %p74_p3  ;;  %s1473_s9 = sand.u32 1, %s1349_s20  }
  0x1d   : > { %s1005_s10 = sshll.u32 %s1473_s9, 5  ;;  %s1025_s11 = sshll.u32 %s1357_s22, 9 }
  0x1e   : > { %s1833_s8 = scalar_select %p1466_p11, 1, 0 }
  0x1f   : > { %s1834_s0 = sld [smem:[#allocation20_spill]]  ;;  %s244_s15 = scalar_lea.vmem [#allocation2], %s1005_s10 }
  0x20   : > { %s253_s16 = sshll.u32 %s244_s15, 4  ;;  %p1486_p0 = pnand %p1058_p13, %p1445_p4  ;;  %s1482_s16 = int_to_ptr.vmem [resolvable:$true] %s253_s16 }
  0x21   : > { %s241_s27 = scalar_lea.sflag [#allocation3], %s1473_s9 }
  0x22   : > { %p1125_p3 = pneg %p1486_p0 }
  0x25   : > { %s1480_s14 = scalar_lea.hbm %s1834_s0, %s1025_s11  ;;  %s1128_s28 = scalar_lea.hbm %s1834_s0, 1024 }
  0x26   : > { %s1123_s29 = scalar_lea.hbm %s1480_s14, 512  ;;  %p1129_p4 = scmp.lt.u32.totalorder %s1480_s14, %s1834_s0 }
  0x27   : > { %p1124_p2 = scmp.ne.s32.totalorder %s1480_s14, %s1123_s29  ;;  %p1130_p7 = scmp.lt.u32.totalorder %s1128_s28, %s1123_s29 }
  0x28   : > { %p1132_p13 = scmp.lt.u32.totalorder %s1123_s29, %s1480_s14 }
  0x29   : > { %p1126_p5 = pnand %p1125_p3, %p1124_p2  ;;  %p1131_p10 = por %p1130_p7, %p1129_p4 }
  0x2b   : > { %p1127_p6 = pneg %p1126_p5  ;;  %p1133_p12 = por %p1132_p13, %p1131_p10 }
  0x2d   : > { %p1134_p1 = pnand %p1133_p12, %p1127_p6 }
  0x2f   : > { %1137 = shalt.err (!%p1134_p1)
}
  0x30   : > { %s1138_s15 = scalar_lea.vmem %s1482_s16, 512  ;;  %s1363_s10 = smov [#allocation2]  }
  0x31   : > { %p1139_p2 = scmp.ne.s32.totalorder %s1482_s16, %s1138_s15  ;;  %s1143_s11 = sshll.u32 %s1363_s10, 4  ;;  %s1144_s11 = int_to_ptr.vmem [resolvable:$false] %s1143_s11 }
  0x32   : > { %s1145_s12 = scalar_lea.vmem %s1144_s11, 1024  ;;  %p1146_p9 = scmp.lt.s32.totalorder %s1482_s16, %s1144_s11 }
  0x33   : > { %p1141_p5 = pnand %p1139_p2, %p1125_p3  ;;  %p1147_p4 = scmp.lt.s32.totalorder %s1145_s12, %s1138_s15 }
  0x35   : > { %p1142_p11 = pneg %p1141_p5  ;;  %p1148_p7 = por %p1147_p4, %p1146_p9 }
  0x37   : > { %p1149_p10 = pnand %p1148_p7, %p1142_p11 }
  0x39   : > { %1152 = shalt.err (!%p1149_p10)
}
  0x3a   : > { %s1364_s29 = smov 128   ;;  %s1365_s28 = smov 8  }
  0x3b   : > { %1041 = dma.hbm_to_vmem [thread:$0]  (!%p1486_p0), %s1480_s14, 512, %s1482_s16, %s241_s27, %s1364_s29, %s1364_s29, %s1365_s28  }
  0x3c   : > { %p281_p12 = scmp.lt.s32.totalorder %s1361_s23, 3  ;;  %s1008_s13 = sshll.u32 %s1473_s9, 3 }
  0x3d   : > { %s1009_s15 = sshll.u32 %s1357_s22, 7  ;;  %p1836_p9 = scmp.ge.s32.totalorder %s1361_s23, 1 }
  0x3e   : > { %s1838_s1 = sld [smem:[#allocation21_spill]]  ;;  %s267_s0 = scalar_lea.vmem [#allocation5], %s1008_s13 }
  0x3f   : > { %p1524_p11 = pnand %p1836_p9, %p281_p12  ;;  %s276_s26 = sshll.u32 %s267_s0, 4  ;;  %s277_s26 = int_to_ptr.vmem [resolvable:$true] %s276_s26 }
  0x40   : > { %s264_s14 = scalar_lea.sflag [#allocation6], %s1473_s9 }
  0x41   : > { %s1837_s10 = scalar_select %p1524_p11, 1, 0 }
  0x44   : > { %s1531_s25 = scalar_lea.hbm %s1838_s1, %s1009_s15  ;;  %s1158_s28 = scalar_lea.hbm %s1838_s1, 256 }
  0x45   : > { %s1153_s16 = scalar_lea.hbm %s1531_s25, 128  ;;  %p1159_p2 = scmp.lt.u32.totalorder %s1531_s25, %s1838_s1 }
  0x46   : > { %p1154_p1 = scmp.ne.s32.totalorder %s1531_s25, %s1153_s16  ;;  %p1160_p5 = scmp.lt.u32.totalorder %s1158_s28, %s1153_s16 }
  0x47   : > { %p1162_p7 = scmp.lt.u32.totalorder %s1153_s16, %s1531_s25 }
  0x48   : > { %p1156_p6 = pnand %p1154_p1, %p1125_p3  ;;  %p1161_p4 = por %p1160_p5, %p1159_p2 }
  0x4a   : > { %p1157_p13 = pneg %p1156_p6  ;;  %p1163_p10 = por %p1162_p7, %p1161_p4 }
  0x4c   : > { %p1164_p12 = pnand %p1163_p10, %p1157_p13 }
  0x4e   : > { %1167 = shalt.err (!%p1164_p12)
}
  0x4f   : > { %s1168_s0 = scalar_lea.vmem %s277_s26, 128  ;;  %s1366_s9 = smov [#allocation5]  }
  0x50   : > { %p1169_p9 = scmp.ne.s32.totalorder %s277_s26, %s1168_s0  ;;  %s1173_s13 = sshll.u32 %s1366_s9, 4  ;;  %s1174_s13 = int_to_ptr.vmem [resolvable:$false] %s1173_s13 }
  0x51   : > { %s1175_s12 = scalar_lea.vmem %s1174_s13, 256  ;;  %p1176_p8 = scmp.lt.s32.totalorder %s277_s26, %s1174_s13 }
  0x52   : > { %p1171_p1 = pnand %p1169_p9, %p1125_p3  ;;  %p1177_p11 = scmp.lt.s32.totalorder %s1175_s12, %s1168_s0 }
  0x54   : > { %p1172_p6 = pneg %p1171_p1  ;;  %p1178_p2 = por %p1177_p11, %p1176_p8 }
  0x56   : > { %p1179_p5 = pnand %p1178_p2, %p1172_p6 }
  0x58   : > { %1182 = shalt.err (!%p1179_p5)
}
  0x59   : > { %1044 = dma.hbm_to_vmem [thread:$0]  (!%p1486_p0), %s1531_s25, 128, %s277_s26, %s264_s14  }
  0x5a   : > { %p1839_p13 = scmp.ne.s32.totalorder %s1837_s10, 0 }
  0x5b   : > { %s1556_s16 = sand.u32 (!%p1839_p13), 1, %s1345_s19   ;;  %p1840_p3 = scmp.ne.s32.totalorder (!%p1839_p13), %s1831_s30, 0 }
  0x5c   : > { %285 = sbr.rel (%p1839_p13) target bundleno = 278 (0x116), region = 28  ;;  %s1011_s27 = sshll.u32 (!%p1839_p13), %s1556_s16, 5 }
  0x5d   : > { %s288_s29 = scalar_lea.sflag (!%p1839_p13), [#allocation3], %s1556_s16  ;;  %s291_s28 = scalar_lea.vmem (!%p1839_p13), [#allocation2], %s1011_s27 }
  0x63   : > { %1320 = dma.done.wait (%p1840_p3), %s288_s29, 512  }
  0x64   : > { %1322 = vsyncadd (%p1840_p3), %s288_s29, 4294966784  ;;  %s1012_s25 = sshll.u32 %s1556_s16, 3  ;;  %s297_s26 = scalar_lea.sflag [#allocation6], %s1556_s16 }
  0x65   : > { %s300_s17 = scalar_lea.vmem [#allocation5], %s1012_s25 }
  0x66   : > { %1324 = dma.done.wait (%p1840_p3), %s297_s26, 128  }
  0x67   : > { %1326 = vsyncadd (%p1840_p3), %s297_s26, 4294967168  ;;  %s1013_s10 = sshll.u32 %s1556_s16, 2  ;;  %v397_v0 = vlaneseq  ;;  %s1572_s14 = scalar_lea.vmem [#allocation11], %s1556_s16  ;;  %v1367_v1 = vmov 0.0   ;;  %v361_v6 = vld [vmem:[%s291_s28] sm:$0xff]  ;;  %v362_v7 = vld [vmem:[%s291_s28 + $0x8] sm:$0xff] }
  0x68   : > { %356 = vst [vmem:[%s1572_s14] sm:$0x1] %v1367_v1  ;;  %s1575_s15 = scalar_lea.vmem [#allocation8], %s1013_s10  ;;  %s1578_s11 = scalar_lea.vmem [#allocation7], %s1013_s10  ;;  %v363_v8 = vld [vmem:[%s291_s28 + $0x10] sm:$0xff]  ;;  %v364_v9 = vld [vmem:[%s291_s28 + $0x18] sm:$0xff]  ;;  %v366_v10 = vmax.f32 %v361_v6, %v362_v7  ;;  %v365_v11 = vld [vmem:[%s300_s17] sm:$0xff] }
  0x69   : > { %354 = vst [vmem:[%s1575_s15] sm:$0xf] %v1367_v1  ;;  %353 = vst [vmem:[%s1578_s11] sm:$0xf] %v1367_v1  ;;  %v398_v2 = vshrl.u32 %v397_v0, 7  ;;  %v400_v3 = vand.u32 127, %v397_v0  ;;  %s1581_s30 = scalar_lea.vmem [#allocation10], %s1013_s10  ;;  %v367_v12 = vmax.f32 %v363_v8, %v364_v9  ;;  %vm392_vm1 = vcmp.eq.s32.totalorder %v365_v11, 0 }
  0x6a   : > { %355 = vst [vmem:[%s1581_s30] sm:$0xf] %v1367_v1  ;;  %vm393_vm2 = vcmp.eq.s32.totalorder %v365_v11, 1  ;;  %vm394_vm3 = vcmp.eq.s32.totalorder %v365_v11, 2  ;;  %vm395_vm4 = vcmp.eq.s32.totalorder %v365_v11, 3  ;;  %vm453_vm9 = vcmask 1041409   ;;  %s733_s0 = sand.u32 1, %s1433_s24  }
  0x6b   : > { %v403_v4 = vmul.u32 128, %v398_v2  ;;  %v368_v14 = vmax.f32 %v366_v10, %v367_v12  ;;  %vm455_vm10 = vcmask 1042434   ;;  %vm457_vm11 = vcmask 1043459   ;;  %s785_s9 = sshll.u32 %s1581_s30, 4  ;;  %s1019_s13 = sshll.u32 %s1353_s21, 6  ;;  %s1651_s9 = int_to_ptr.vmem [resolvable:$true] %s785_s9 }
  0x6c   : > { %s771_s12 = sshll.u32 %s1575_s15, 4  ;;  %s757_s27 = sshll.u32 %s1578_s11, 4  ;;  %s1662_s12 = int_to_ptr.vmem [resolvable:$true] %s771_s12  ;;  %s1678_s27 = int_to_ptr.vmem [resolvable:$true] %s757_s27 }
  0x6d   : > { %v1584_v5 = vadd.s32 %v403_v4, %v400_v3  ;;  %v369_v20 = vsub.f32 %v361_v6, %v368_v14  ;;  %v370_v21 = vsub.f32 %v362_v7, %v368_v14  ;;  %v371_v22 = vsub.f32 %v363_v8, %v368_v14  ;;  %s1660_s25 = scalar_lea.hbm %s1818_s3, %s1019_s13  ;;  %s1669_s10 = scalar_lea.hbm %s1819_s4, %s1019_s13 }
  0x6e   : > { %v372_v23 = vsub.f32 %v364_v9, %v368_v14  ;;  %s1676_s28 = scalar_lea.hbm %s1817_s2, %s1019_s13  ;;  %s1684_s1 = scalar_lea.sflag [#allocation9], %s733_s0 }
  0x6f   : > { %vm405_vm0 = vcmp.lt.s32.totalorder %v1584_v5, 256  ;;  %v373_v29 = vmul.f32 1.442695, %v369_v20  ;;  %v375_v30 = vmul.f32 1.442695, %v370_v21  ;;  %s1183_s26 = scalar_lea.vmem %s1662_s12, 64 }
  0x70   : > { %vm1589_vm5 = vmand %vm392_vm1, %vm405_vm0  ;;  %v377_v31 = vmul.f32 1.442695, %v371_v22  ;;  %v379_v32 = vmul.f32 1.442695, %v372_v23  ;;  %p1184_p8 = scmp.ne.s32.totalorder %s1662_s12, %s1183_s26  ;;  %p1849_p0 = scmp.ne.s32.totalorder %s1832_s6, 0 }
  0x71   : > { %vm1595_vm6 = vmand %vm393_vm2, %vm405_vm0  ;;  %v420_v16 = vsel %vm1589_vm5, 1.0, %v1367_v1  ;;  %1111 = vpow2.f32 %v373_v29  ;;  %v497_v55 = vld [vmem:[%s1581_s30] sm:$0xf] }
  0x72   : > { %vm1603_vm7 = vmand %vm394_vm3, %vm405_vm0  ;;  %v421_v18 = vsel %vm1595_vm6, 1.0, %v1367_v1  ;;  %v498_v19 = vrot.slane %v420_v16, 4  ;;  %1113 = vpow2.f32 %v375_v30  ;;  %p1185_p11 = pnand %p1184_p8, %p1849_p0 }
  0x73   : > { %vm1611_vm8 = vmand %vm395_vm4, %vm405_vm0  ;;  %v422_v25 = vsel %vm1603_vm7, 1.0, %v1367_v1  ;;  %v504_v28 = vrot.slane %v421_v18, 4  ;;  %1115 = vpow2.f32 %v377_v31 }
  0x74   : > { %v423_v26 = vsel %vm1611_vm8, 1.0, %v1367_v1  ;;  %v499_v27 = vadd.f32 %v498_v19, %v420_v16  ;;  %v510_v35 = vrot.slane %v422_v25, 4  ;;  %1117 = vpow2.f32 %v379_v32  ;;  %p1186_p4 = pneg %p1185_p11 }
  0x75   : > { %v505_v34 = vadd.f32 %v504_v28, %v421_v18  ;;  %v516_v36 = vrot.slane %v423_v26, 4 }
  0x76   : > { %v500_v33 = vrot.slane %v499_v27, 2  ;;  %v511_v39 = vadd.f32 %v510_v35, %v422_v25 }
  0x77   : > { %v506_v38 = vrot.slane %v505_v34, 2  ;;  %v517_v40 = vadd.f32 %v516_v36, %v423_v26 }
  0x78   : > { %v501_v37 = vadd.f32 %v500_v33, %v499_v27  ;;  %v512_v43 = vrot.slane %v511_v39, 2 }
  0x79   : > { %v507_v42 = vadd.f32 %v506_v38, %v505_v34  ;;  %v518_v44 = vrot.slane %v517_v40, 2 }
  0x7a   : > { %v502_v41 = vrot.slane %v501_v37, 1  ;;  %v513_v47 = vadd.f32 %v512_v43, %v511_v39 }
  0x7b   : > { %v508_v46 = vrot.slane %v507_v42, 1  ;;  %v519_v48 = vadd.f32 %v518_v44, %v517_v40  ;;  %v1112_v54 = vpop.eup %1111 }
  0x7c   : > { %v503_v45 = vadd.f32 %v502_v41, %v501_v37  ;;  %v514_v50 = vrot.slane %v513_v47, 1  ;;  %v1114_v57 = vpop.eup %1113 }
  0x7d   : > { %v509_v49 = vadd.f32 %v508_v46, %v507_v42  ;;  %v520_v51 = vrot.slane %v519_v48, 1  ;;  %v1116_v59 = vpop.eup %1115  ;;  %v381_v60 = vadd.f32 %v1114_v57, %v1112_v54 }
  0x7e   : > { %v515_v52 = vadd.f32 %v514_v50, %v513_v47  ;;  %v1118_v62 = vpop.eup %1117 }
  0x7f   : > { %v526_v53 = vsel %vm453_vm9, %v509_v49, %v503_v45  ;;  %v521_v56 = vadd.f32 %v520_v51, %v519_v48  ;;  %v382_v0 = vadd.f32 %v1116_v59, %v381_v60 }
  0x80   : > { %v527_v58 = vsel %vm455_vm10, %v515_v52, %v526_v53 }
  0x81   : > { %v528_v61 = vsel %vm457_vm11, %v521_v56, %v527_v58  ;;  %v383_v1 = vadd.f32 %v1118_v62, %v382_v0 }
  0x82   : > { %v530_v63 = vadd.f32 %v528_v61, %v497_v55 }
  0x83   : > { %1119 = vrcp.f32 %v383_v1 }
  0x84   : > { %531 = vst [vmem:[%s1581_s30] sm:$0xf] %v530_v63  ;;  %v462_v63 = vld [vmem:[%s1575_s15] sm:$0xf] }
  0x8d   : > { %v1120_v2 = vpop.eup %1119 }
  0x8e   : > { %v385_v3 = vmul.f32 %v1120_v2, %v383_v1 }
  0x90   : > { %v386_v4 = vsub.f32 2.0, %v385_v3 }
  0x92   : > { %v387_v6 = vmul.f32 %v1120_v2, %v386_v4 }
  0x94   : > { %v388_v7 = vmul.f32 %v1112_v54, %v387_v6  ;;  %v389_v8 = vmul.f32 %v1114_v57, %v387_v6  ;;  %v390_v9 = vmul.f32 %v1116_v59, %v387_v6  ;;  %v391_v10 = vmul.f32 %v1118_v62, %v387_v6 }
  0x96   : > { %v412_v11 = vsel %vm405_vm0, %v388_v7, 0.0  ;;  %v413_v12 = vsel %vm405_vm0, %v389_v8, 0.0  ;;  %v414_v14 = vsel %vm405_vm0, %v390_v9, 0.0  ;;  %v415_v16 = vsel %vm405_vm0, %v391_v10, 0.0 }
  0x97   : > { %v463_v18 = vrot.slane %v412_v11, 4  ;;  %v469_v19 = vrot.slane %v413_v12, 4  ;;  %v475_v20 = vrot.slane %v414_v14, 4  ;;  %v481_v21 = vrot.slane %v415_v16, 4 }
  0x98   : > { %v416_v22 = vsel %vm1589_vm5, %v388_v7, 0.0  ;;  %v417_v23 = vsel %vm1595_vm6, %v389_v8, 0.0  ;;  %v418_v25 = vsel %vm1603_vm7, %v390_v9, 0.0  ;;  %v1640_v26 = vsel %vm1611_vm8, %v391_v10, 0.0 }
  0x99   : > { %v464_v27 = vadd.f32 %v463_v18, %v412_v11  ;;  %v470_v28 = vadd.f32 %v469_v19, %v413_v12  ;;  %v476_v29 = vadd.f32 %v475_v20, %v414_v14  ;;  %v482_v30 = vadd.f32 %v481_v21, %v415_v16  ;;  %v424_v11 = vld [vmem:[%s1578_s11] sm:$0xf] }
  0x9a   : > { %v425_v31 = vrot.slane %v416_v22, 4  ;;  %v431_v32 = vrot.slane %v417_v23, 4  ;;  %v437_v33 = vrot.slane %v418_v25, 4  ;;  %v443_v13 = vrot.slane %v1640_v26, 4 }
  0x9b   : > { %v465_v34 = vrot.slane %v464_v27, 2  ;;  %v471_v35 = vrot.slane %v470_v28, 2  ;;  %v477_v15 = vrot.slane %v476_v29, 2  ;;  %v483_v36 = vrot.slane %v482_v30, 2 }
  0x9c   : > { %v426_v37 = vadd.f32 %v425_v31, %v416_v22  ;;  %v432_v17 = vadd.f32 %v431_v32, %v417_v23  ;;  %v438_v38 = vadd.f32 %v437_v33, %v418_v25  ;;  %v444_v24 = vadd.f32 %v443_v13, %v1640_v26 }
  0x9d   : > { %v466_v39 = vadd.f32 %v465_v34, %v464_v27  ;;  %v472_v40 = vadd.f32 %v471_v35, %v470_v28  ;;  %v478_v41 = vadd.f32 %v477_v15, %v476_v29  ;;  %v484_v42 = vadd.f32 %v483_v36, %v482_v30 }
  0x9e   : > { %v427_v43 = vrot.slane %v426_v37, 2  ;;  %v433_v44 = vrot.slane %v432_v17, 2  ;;  %v439_v45 = vrot.slane %v438_v38, 2  ;;  %v445_v46 = vrot.slane %v444_v24, 2 }
  0x9f   : > { %v467_v47 = vrot.slane %v466_v39, 1  ;;  %v473_v48 = vrot.slane %v472_v40, 1  ;;  %v479_v49 = vrot.slane %v478_v41, 1  ;;  %v485_v50 = vrot.slane %v484_v42, 1 }
  0xa0   : > { %v428_v51 = vadd.f32 %v427_v43, %v426_v37  ;;  %v434_v52 = vadd.f32 %v433_v44, %v432_v17  ;;  %v440_v53 = vadd.f32 %v439_v45, %v438_v38  ;;  %v446_v54 = vadd.f32 %v445_v46, %v444_v24 }
  0xa1   : > { %v468_v55 = vadd.f32 %v467_v47, %v466_v39  ;;  %v474_v56 = vadd.f32 %v473_v48, %v472_v40  ;;  %v480_v57 = vadd.f32 %v479_v49, %v478_v41  ;;  %v486_v58 = vadd.f32 %v485_v50, %v484_v42 }
  0xa2   : > { %v429_v59 = vrot.slane %v428_v51, 1  ;;  %v435_v60 = vrot.slane %v434_v52, 1  ;;  %v441_v61 = vrot.slane %v440_v53, 1  ;;  %v447_v62 = vrot.slane %v446_v54, 1 }
  0xa3   : > { %v491_v0 = vsel %vm453_vm9, %v474_v56, %v468_v55  ;;  %v532_v1 = vadd.f32 %v417_v23, %v416_v22 }
  0xa4   : > { %v492_v2 = vsel %vm455_vm10, %v480_v57, %v491_v0  ;;  %v430_v3 = vadd.f32 %v429_v59, %v428_v51  ;;  %v436_v4 = vadd.f32 %v435_v60, %v434_v52  ;;  %v442_v6 = vadd.f32 %v441_v61, %v440_v53 }
  0xa5   : > { %v493_v7 = vsel %vm457_vm11, %v486_v58, %v492_v2  ;;  %v448_v8 = vadd.f32 %v447_v62, %v446_v54  ;;  %v533_v9 = vadd.f32 %v532_v1, %v418_v25 }
  0xa6   : > { %v495_v10 = vadd.f32 %v493_v7, %v462_v63  ;;  %v454_v12 = vsel %vm453_vm9, %v436_v4, %v430_v3 }
  0xa7   : > { %v456_v14 = vsel %vm455_vm10, %v442_v6, %v454_v12  ;;  %v534_v16 = vadd.f32 %v533_v9, %v1640_v26 }
  0xa8   : > { %496 = vst [vmem:[%s1575_s15] sm:$0xf] %v495_v10  ;;  %v458_v18 = vsel %vm457_vm11, %v448_v8, %v456_v14  ;;  %s1368_s15 = smov [#allocation8]  }
  0xa9   : > { %v460_v19 = vadd.f32 %v458_v18, %v424_v11  ;;  %v1680_v20 = vadd.f32 1e-10, %v534_v16  ;;  %s1187_s17 = sshll.u32 %s1368_s15, 4  ;;  %s1188_s17 = int_to_ptr.vmem [resolvable:$false] %s1187_s17 }
  0xaa   : > { %s1189_s22 = scalar_lea.vmem %s1188_s17, 128  ;;  %p1190_p7 = scmp.lt.s32.totalorder %s1662_s12, %s1188_s17 }
  0xab   : > { %p1191_p10 = scmp.lt.s32.totalorder %s1189_s22, %s1183_s26 }
  0xad   : > { %p1192_p12 = por %p1191_p10, %p1190_p7 }
  0xaf   : > { %p1193_p9 = pnand %p1192_p12, %p1186_p4 }
  0xb1   : > { %1196 = shalt.err (!%p1193_p9)
}
  0xb2   : > { %s1197_s24 = scalar_lea.hbm %s1660_s25, 64  ;;  %s1201_s30 = scalar_lea.hbm %s1818_s3, 128 }
  0xb3   : > { %p1198_p1 = scmp.ne.s32.totalorder %s1660_s25, %s1197_s24  ;;  %p1202_p5 = scmp.lt.u32.totalorder %s1660_s25, %s1818_s3 }
  0xb4   : > { %p1203_p13 = scmp.lt.u32.totalorder %s1201_s30, %s1197_s24  ;;  %p1205_p8 = scmp.lt.u32.totalorder %s1197_s24, %s1660_s25 }
  0xb5   : > { %p1199_p6 = pnand %p1198_p1, %p1849_p0 }
  0xb6   : > { %p1204_p3 = por %p1203_p13, %p1202_p5 }
  0xb7   : > { %p1200_p2 = pneg %p1199_p6 }
  0xb8   : > { %p1206_p11 = por %p1205_p8, %p1204_p3 }
  0xba   : > { %p1207_p4 = pnand %p1206_p11, %p1200_p2 }
  0xbc   : > { %1210 = shalt.err (!%p1207_p4)
}
  0xbd   : > { %1031 = dma.vmem_to_hbm [thread:$0]  (%p1849_p0), %s1662_s12, 64, %s1660_s25, %s1684_s1  }
  0xbe   : > { %s1211_s22 = scalar_lea.vmem %s1651_s9, 64  ;;  %s1369_s26 = smov [#allocation10]  }
  0xbf   : > { %p1212_p7 = scmp.ne.s32.totalorder %s1651_s9, %s1211_s22  ;;  %s1215_s17 = sshll.u32 %s1369_s26, 4  ;;  %s1216_s17 = int_to_ptr.vmem [resolvable:$false] %s1215_s17 }
  0xc0   : > { %s1217_s24 = scalar_lea.vmem %s1216_s17, 128  ;;  %p1218_p9 = scmp.lt.s32.totalorder %s1651_s9, %s1216_s17 }
  0xc1   : > { %p1213_p10 = pnand %p1212_p7, %p1849_p0  ;;  %p1219_p1 = scmp.lt.s32.totalorder %s1217_s24, %s1211_s22 }
  0xc3   : > { %p1214_p12 = pneg %p1213_p10  ;;  %p1220_p6 = por %p1219_p1, %p1218_p9 }
  0xc5   : > { %p1221_p2 = pnand %p1220_p6, %p1214_p12 }
  0xc7   : > { %1224 = shalt.err (!%p1221_p2)
}
  0xc8   : > { %s1225_s12 = scalar_lea.hbm %s1669_s10, 64  ;;  %s1229_s13 = scalar_lea.hbm %s1819_s4, 128 }
  0xc9   : > { %p1226_p5 = scmp.ne.s32.totalorder %s1669_s10, %s1225_s12  ;;  %p1230_p8 = scmp.lt.u32.totalorder %s1669_s10, %s1819_s4 }
  0xca   : > { %p1231_p11 = scmp.lt.u32.totalorder %s1229_s13, %s1225_s12  ;;  %p1233_p7 = scmp.lt.u32.totalorder %s1225_s12, %s1669_s10 }
  0xcb   : > { %p1227_p13 = pnand %p1226_p5, %p1849_p0 }
  0xcc   : > { %p1232_p4 = por %p1231_p11, %p1230_p8 }
  0xcd   : > { %p1228_p3 = pneg %p1227_p13 }
  0xce   : > { %p1234_p10 = por %p1233_p7, %p1232_p4 }
  0xd0   : > { %p1235_p12 = pnand %p1234_p10, %p1228_p3 }
  0xd2   : > { %1238 = shalt.err (!%p1235_p12)
}
  0xd3   : > { %1032 = dma.vmem_to_hbm [thread:$0]  (%p1849_p0), %s1651_s9, 64, %s1669_s10, %s1684_s1   ;;  %461 = vst [vmem:[%s1578_s11] sm:$0xf] %v460_v19  ;;  %v539_v21 = vadd.f32 1e-10, %v1680_v20 }
  0xd4   : > { %s729_s15 = scalar_lea.sflag [#allocation4], %s1556_s16  ;;  %s1239_s22 = scalar_lea.vmem %s1678_s27, 64 }
  0xd5   : > { %p1240_p9 = scmp.ne.s32.totalorder %s1678_s27, %s1239_s22  ;;  %s1370_s26 = smov [#allocation7]  }
  0xd6   : > { %s1243_s17 = sshll.u32 %s1370_s26, 4  ;;  %s1244_s17 = int_to_ptr.vmem [resolvable:$false] %s1243_s17 }
  0xd7   : > { %p1241_p1 = pnand %p1240_p9, %p1849_p0  ;;  %s1245_s24 = scalar_lea.vmem %s1244_s17, 128 }
  0xd8   : > { %p1246_p2 = scmp.lt.s32.totalorder %s1678_s27, %s1244_s17  ;;  %p1247_p5 = scmp.lt.s32.totalorder %s1245_s24, %s1239_s22 }
  0xd9   : > { %p1242_p6 = pneg %p1241_p1 }
  0xda   : > { %p1248_p13 = por %p1247_p5, %p1246_p2 }
  0xdc   : > { %p1249_p3 = pnand %p1248_p13, %p1242_p6 }
  0xde   : > { %1252 = shalt.err (!%p1249_p3)
}
  0xdf   : > { %s1253_s1 = scalar_lea.hbm %s1676_s28, 64  ;;  %s1257_s10 = scalar_lea.hbm %s1817_s2, 128 }
  0xe0   : > { %p1254_p8 = scmp.ne.s32.totalorder %s1676_s28, %s1253_s1  ;;  %p1258_p7 = scmp.lt.u32.totalorder %s1676_s28, %s1817_s2 }
  0xe1   : > { %p1259_p10 = scmp.lt.u32.totalorder %s1257_s10, %s1253_s1  ;;  %p1261_p9 = scmp.lt.u32.totalorder %s1253_s1, %s1676_s28 }
  0xe2   : > { %p1255_p11 = pnand %p1254_p8, %p1849_p0 }
  0xe3   : > { %p1260_p12 = por %p1259_p10, %p1258_p7 }
  0xe4   : > { %p1256_p4 = pneg %p1255_p11 }
  0xe5   : > { %p1262_p1 = por %p1261_p9, %p1260_p12 }
  0xe7   : > { %p1263_p6 = pnand %p1262_p1, %p1256_p4 }
  0xe9   : > { %1266 = shalt.err (!%p1263_p6)
}
  0xea   : > { %1030 = dma.vmem_to_hbm [thread:$0]  (%p1849_p0), %s1678_s27, 64, %s1676_s28, %s729_s15   ;;  %1121 = vlog2.f32 %v539_v21  ;;  %v536_v22 = vsub.f32 1.0, %v1680_v20  ;;  %v544_v34 = vld [vmem:[%s1572_s14] sm:$0x1] }
  0xeb   : > { %s1022_s27 = sshll.u32 %s1353_s21, 4  ;;  %s799_s28 = sshll.u32 %s1572_s14, 4  ;;  %s1765_s28 = int_to_ptr.vmem [resolvable:$true] %s799_s28 }
  0xec   : > { %v537_v23 = vmul.f32 %v536_v22, %v536_v22  ;;  %s1763_s30 = scalar_lea.hbm %s1820_s5, %s1022_s27  ;;  %s744_s29 = scalar_lea.sflag [#allocation12], %s1556_s16 }
  0xed   : > { %s1267_s15 = scalar_lea.vmem %s1765_s28, 16  ;;  %s1371_s21 = smov [#allocation11]  }
  0xee   : > { %v538_v25 = vmul.f32 -0.25, %v537_v23  ;;  %p1268_p2 = scmp.ne.s32.totalorder %s1765_s28, %s1267_s15  ;;  %s1271_s22 = sshll.u32 %s1371_s21, 4  ;;  %s1272_s22 = int_to_ptr.vmem [resolvable:$false] %s1271_s22 }
  0xef   : > { %s1273_s26 = scalar_lea.vmem %s1272_s22, 32  ;;  %p1274_p3 = scmp.lt.s32.totalorder %s1765_s28, %s1272_s22 }
  0xf0   : > { %p1269_p5 = pnand %p1268_p2, %p1849_p0  ;;  %p1275_p8 = scmp.lt.s32.totalorder %s1273_s26, %s1267_s15 }
  0xf2   : > { %p1270_p13 = pneg %p1269_p5  ;;  %p1276_p11 = por %p1275_p8, %p1274_p3 }
  0xf4   : > { %v1122_v26 = vpop.eup %1121  ;;  %p1277_p4 = pnand %p1276_p11, %p1270_p13 }
  0xf5   : > { %v541_v27 = vmul.f32 0.6931472, %v1122_v26 }
  0xf7   : > { %v542_v28 = vmul.f32 %v541_v27, %v538_v25 }
  0xf9   : > { %v543_v29 = vsel %vm405_vm0, %v542_v28, 0.0 }
  0xfa   : > { %v545_v30 = vrot.slane %v543_v29, 4 }
  0xfc   : > { %v546_v31 = vadd.f32 %v545_v30, %v543_v29 }
  0xfe   : > { %v547_v32 = vrot.slane %v546_v31, 2 }
 0x100   : > { %v548_v33 = vadd.f32 %v547_v32, %v546_v31 }
 0x102   : > { %v549_v13 = vrot.slane %v548_v33, 1 }
 0x104   : > { %v550_v35 = vadd.f32 %v549_v13, %v548_v33 }
 0x106   : > { %v551_v15 = vadd.f32 %v550_v35, %v544_v34 }
 0x108   : > { %552 = vst [vmem:[%s1572_s14] sm:$0x1] %v551_v15 }
 0x109   : > { %1280 = shalt.err (!%p1277_p4)
}
 0x10a   : > { %s1281_s16 = scalar_lea.hbm %s1763_s30, 16  ;;  %s1285_s24 = scalar_lea.hbm %s1820_s5, 32 }
 0x10b   : > { %p1282_p7 = scmp.ne.s32.totalorder %s1763_s30, %s1281_s16  ;;  %p1286_p9 = scmp.lt.u32.totalorder %s1763_s30, %s1820_s5 }
 0x10c   : > { %p1287_p1 = scmp.lt.u32.totalorder %s1285_s24, %s1281_s16  ;;  %p1289_p2 = scmp.lt.u32.totalorder %s1281_s16, %s1763_s30 }
 0x10d   : > { %p1283_p10 = pnand %p1282_p7, %p1849_p0 }
 0x10e   : > { %p1288_p6 = por %p1287_p1, %p1286_p9 }
 0x10f   : > { %p1284_p12 = pneg %p1283_p10 }
 0x110   : > { %p1290_p5 = por %p1289_p2, %p1288_p6 }
 0x112   : > { %p1291_p13 = pnand %p1290_p5, %p1284_p12 }
 0x114   : > { %1294 = shalt.err (!%p1291_p13)
}
 0x115   : > { %1033 = dma.vmem_to_hbm [thread:$0]  (%p1849_p0), %s1765_s28, 16, %s1763_s30, %s744_s29  }
 0x116 PF: > { %s811_s9 = sand.u32 1, %s1341_s18   ;;  %p1850_p3 = scmp.ne.s32.totalorder %s1833_s8, 0 }
 0x117   : > { %p1851_p8 = scmp.ge.s32.totalorder %s1361_s23, 2  ;;  %s812_s10 = scalar_lea.sflag [#allocation4], %s811_s9 }
 0x119   : > { %p1046_p11 = pnand %p1851_p8, %p1850_p3 }
 0x11b   : > { %1328 = dma.done.wait (!%p1046_p11), %s812_s10, 64  }
 0x11c   : > { %1330 = vsyncadd (!%p1046_p11), %s812_s10, 4294967232  ;;  %s1852_s12 = sadd.s32 4294967294, %s1361_s23  }
 0x11d   : > { %s820_s25 = sand.u32 1, %s1852_s12  }
 0x11e   : > { %s821_s27 = scalar_lea.sflag [#allocation9], %s820_s25 }
 0x11f   : > { %1332 = dma.done.wait (!%p1046_p11), %s821_s27, 128  }
 0x120   : > { %1334 = vsyncadd (!%p1046_p11), %s821_s27, 4294967168  ;;  %s839_s6 = scalar_lea.sflag [#allocation12], %s811_s9 }
 0x121   : > { %1336 = dma.done.wait (!%p1046_p11), %s839_s6, 16  }
 0x122   : > { %1338 = vsyncadd (!%p1046_p11), %s839_s6, 4294967280  ;;  %s31_s23 = sadd.s32 1, %s1361_s23   ;;  %s1853_s21 = sld [smem:[#allocation18_spill]] }
 0x123   : > { %p28_p0 = scmp.ge.s32.totalorder %s31_s23, 4   ;;  %s1854_s22 = sld [smem:[#allocation19_spill]] }
 0x124   : > { %s1855_s18 = smov %s1345_s19  ;;  %s1856_s19 = smov %s1349_s20 }
 0x125   : > { %s1857_s20 = smov %s1464_s7  ;;  %30 = sbr.rel (!%p28_p0) target bundleno = 15 (0xf), region = 147 }
 0x12c   :  { %843 = vsyncpa [#allocation3], 1 }
 0x12d   :  { %845 = vsyncpa [#allocation3 + $0x1], 1 }
 0x12e   :  { %846 = vsyncpa [#allocation6], 1 }
 0x12f   :  { %848 = vsyncpa [#allocation6 + $0x1], 1 }
 0x130   :  { %849 = vsyncpa [#allocation4], 1 }
 0x131   :  { %851 = vsyncpa [#allocation4 + $0x1], 1 }
 0x132   :  { %852 = vsyncpa [#allocation9], 1 }
 0x133   :  { %854 = vsyncpa [#allocation9 + $0x1], 1 }
 0x134   :  { %855 = vsyncpa [#allocation12], 1 }
 0x135   :  { %857 = vsyncpa [#allocation12 + $0x1], 1 }

</bundles_post_ra>
